<compile_context>
chip_gen: v6e
topology: v6e:2x2x1
jax: 0.10.0
libtpu: 0.0.40
codegen_flags: <defaults>
</compile_context>

<pallas_src>
import jax
import jax.numpy as jnp
from jax.experimental import pallas as pl
from jax.experimental.pallas import tpu as pltpu

LAYERS = [2, 20, 20, 40, 40, 20, 20, 4]
N_LAYERS = len(LAYERS) - 1                 # 7 linear layers
SUB = 8                                    # f32 sublane granularity
LANE = 128                                 # lane granularity
PADS = [((d + SUB - 1) // SUB) * SUB for d in LAYERS]   # [8, 24, 24, 40, 40, 24, 24, 8]
MAX_TB = 2048                              # max batch tile (lanes), multiple of 128


def _round_up(x, m):
    return ((x + m - 1) // m) * m


def _mlp_kernel(x_ref, *refs):
    # x_ref : (PADS[0], TB)             batch on lanes, features on sublanes
    # refs  : (w0, b0, w1, b1, ..., w6, b6, o_ref)
    #   w_l : (PADS[l+1], PADS[l])      pre-transposed (out, in), zero-padded
    #   b_l : (PADS[l+1], 1)
    # o_ref : (PADS[-1], TB)
    o_ref = refs[-1]
    h = x_ref[...]
    for l in range(N_LAYERS):              # static unroll over 7 layers
        w = refs[2 * l][...]
        b = refs[2 * l + 1][...]
        h = jnp.dot(w, h, preferred_element_type=jnp.float32) + b
        if l < N_LAYERS - 1:
            h = jnp.tanh(h)
    o_ref[...] = h


@jax.jit
def pinn_forward(x, params):
    """x: (N, 2) float32 -> (N, 4) float32.  params: list of 7 (w_pad, b_pad)."""
    n = x.shape[0]
    n_lane = _round_up(max(n, 1), LANE)

    # Batch tile: as large as possible, but guarantee >= 2 grid steps when the batch
    # allows it so v7x's two TensorCores both get work on the "parallel" axis.
    tb = min(MAX_TB, n_lane)
    if tb == n_lane and n_lane >= 2 * LANE:
        tb = _round_up(n_lane // 2, LANE)
    n_pad = _round_up(n_lane, tb)

    # Pad features 2 -> 8 sublanes and batch to n_pad lanes; transpose to (feat, batch).
    x_t = jnp.zeros((PADS[0], n_pad), jnp.float32).at[: LAYERS[0], :n].set(x.T)

    in_specs = [pl.BlockSpec((PADS[0], tb), lambda i: (0, i))]
    flat_params = []
    for l in range(N_LAYERS):
        w, b = params[l]
        # Full-array blocks, constant index_map -> weights stay resident in VMEM.
        in_specs.append(pl.BlockSpec(w.shape, lambda i: (0, 0)))
        in_specs.append(pl.BlockSpec(b.shape, lambda i: (0, 0)))
        flat_params += [w, b]

    flops = 2 * n_pad * sum(PADS[l] * PADS[l + 1] for l in range(N_LAYERS))
    transcendentals = n_pad * sum(PADS[1:-1])
    bytes_accessed = 4 * (
        PADS[0] * n_pad + PADS[-1] * n_pad + sum(int(p.size) for p in flat_params)
    )

    out_t = pl.pallas_call(
        _mlp_kernel,
        out_shape=jax.ShapeDtypeStruct((PADS[-1], n_pad), jnp.float32),
        grid_spec=pltpu.PrefetchScalarGridSpec(
            num_scalar_prefetch=0,
            grid=(n_pad // tb,),
            in_specs=in_specs,
            out_specs=pl.BlockSpec((PADS[-1], tb), lambda i: (0, i)),
        ),
        compiler_params=pltpu.CompilerParams(
            dimension_semantics=("parallel",),
        ),
        cost_estimate=pl.CostEstimate(
            flops=flops,
            transcendentals=transcendentals,
            bytes_accessed=bytes_accessed,
        ),
    )(x_t, *flat_params)

    return out_t[: LAYERS[-1], :n].T


def init_params(key):
    """nn.Linear-style init (uniform +-1/sqrt(fan_in)), PyTorch (out, in) layout.

    Returns (padded transposed kernel params, raw per-layer (W, b) for the reference).
    """
    padded, raw = [], []
    for l in range(N_LAYERS):
        fan_in, fan_out = LAYERS[l], LAYERS[l + 1]
        key, kw, kb = jax.random.split(key, 3)
        bound = 1.0 / (fan_in ** 0.5)
        w = jax.random.uniform(kw, (fan_out, fan_in), jnp.float32, -bound, bound)
        b = jax.random.uniform(kb, (fan_out,), jnp.float32, -bound, bound)
        raw.append((w, b))
        wp = jnp.zeros((PADS[l + 1], PADS[l]), jnp.float32).at[:fan_out, :fan_in].set(w)
        bp = jnp.zeros((PADS[l + 1], 1), jnp.float32).at[:fan_out, 0].set(b)
        padded.append((wp, bp))
    return padded, raw


def reference_forward(x, raw):
    h = x
    for l, (w, b) in enumerate(raw):
        h = h @ w.T + b
        if l < N_LAYERS - 1:
            h = jnp.tanh(h)
    return h


if __name__ == "__main__":
    key = jax.random.PRNGKey(0)
    params, raw = init_params(key)

    # Small batch of (t, x) coordinate pairs, consistent with layers[0] = 2.
    key, kx = jax.random.split(key)
    x_small = jax.random.normal(kx, (8, LAYERS[0]), jnp.float32)
    out = jax.block_until_ready(pinn_forward(x_small, params))
    ref = reference_forward(x_small, raw)
    assert out.shape == (8, LAYERS[-1]), out.shape
    assert jnp.allclose(out, ref, atol=1e-4, rtol=1e-4), float(jnp.max(jnp.abs(out - ref)))

    # Larger, non-tile-divisible batch: exercises the lane padding, the tile-halving
    # (2 grid steps) path, and the parallel batch grid.
    key, kx2 = jax.random.split(key)
    x_big = jax.random.normal(kx2, (1000, LAYERS[0]), jnp.float32)
    out_big = jax.block_until_ready(pinn_forward(x_big, params))
    ref_big = reference_forward(x_big, raw)
    assert out_big.shape == (1000, LAYERS[-1]), out_big.shape
    assert jnp.allclose(out_big, ref_big, atol=1e-4, rtol=1e-4), float(
        jnp.max(jnp.abs(out_big - ref_big))
    )

    print("KERNEL_OK")
</pallas_src>

<mosaic_0001>
module attributes {stable_mosaic.version = 11 : i64} {
  func.func @_mlp_kernel(%arg0: i32, %arg1: memref<8x128xf32, #tpu.memory_space<vmem>>, %arg2: memref<24x8xf32, #tpu.memory_space<vmem>>, %arg3: memref<24x1xf32, #tpu.memory_space<vmem>>, %arg4: memref<24x24xf32, #tpu.memory_space<vmem>>, %arg5: memref<24x1xf32, #tpu.memory_space<vmem>>, %arg6: memref<40x24xf32, #tpu.memory_space<vmem>>, %arg7: memref<40x1xf32, #tpu.memory_space<vmem>>, %arg8: memref<40x40xf32, #tpu.memory_space<vmem>>, %arg9: memref<40x1xf32, #tpu.memory_space<vmem>>, %arg10: memref<24x40xf32, #tpu.memory_space<vmem>>, %arg11: memref<24x1xf32, #tpu.memory_space<vmem>>, %arg12: memref<24x24xf32, #tpu.memory_space<vmem>>, %arg13: memref<24x1xf32, #tpu.memory_space<vmem>>, %arg14: memref<8x24xf32, #tpu.memory_space<vmem>>, %arg15: memref<8x1xf32, #tpu.memory_space<vmem>>, %arg16: memref<8x128xf32, #tpu.memory_space<vmem>>) attributes {dimension_semantics = [#tpu.dimension_semantics<parallel>], iteration_bounds = array<i64: 1>, scalar_prefetch = 0 : i64, scratch_operands = 0 : i64, tpu.core_type = #tpu.core_type<tc>, window_params = [{transform_indices = @transform_0, window_bounds = array<i64: 8, 128>}, {pipeline_mode = #tpu.pipeline_mode<synchronous>, transform_indices = @transform_1, window_bounds = array<i64: 24, 8>}, {pipeline_mode = #tpu.pipeline_mode<synchronous>, transform_indices = @transform_2, window_bounds = array<i64: 24, 1>}, {pipeline_mode = #tpu.pipeline_mode<synchronous>, transform_indices = @transform_3, window_bounds = array<i64: 24, 24>}, {pipeline_mode = #tpu.pipeline_mode<synchronous>, transform_indices = @transform_4, window_bounds = array<i64: 24, 1>}, {pipeline_mode = #tpu.pipeline_mode<synchronous>, transform_indices = @transform_5, window_bounds = array<i64: 40, 24>}, {pipeline_mode = #tpu.pipeline_mode<synchronous>, transform_indices = @transform_6, window_bounds = array<i64: 40, 1>}, {pipeline_mode = #tpu.pipeline_mode<synchronous>, transform_indices = @transform_7, window_bounds = array<i64: 40, 40>}, {pipeline_mode = #tpu.pipeline_mode<synchronous>, transform_indices = @transform_8, window_bounds = array<i64: 40, 1>}, {pipeline_mode = #tpu.pipeline_mode<synchronous>, transform_indices = @transform_9, window_bounds = array<i64: 24, 40>}, {pipeline_mode = #tpu.pipeline_mode<synchronous>, transform_indices = @transform_10, window_bounds = array<i64: 24, 1>}, {pipeline_mode = #tpu.pipeline_mode<synchronous>, transform_indices = @transform_11, window_bounds = array<i64: 24, 24>}, {pipeline_mode = #tpu.pipeline_mode<synchronous>, transform_indices = @transform_12, window_bounds = array<i64: 24, 1>}, {pipeline_mode = #tpu.pipeline_mode<synchronous>, transform_indices = @transform_13, window_bounds = array<i64: 8, 24>}, {pipeline_mode = #tpu.pipeline_mode<synchronous>, transform_indices = @transform_14, window_bounds = array<i64: 8, 1>}, {transform_indices = @transform_15, window_bounds = array<i64: 8, 128>}]} {
    %c0 = arith.constant 0 : index
    %c0_0 = arith.constant 0 : index
    %0 = vector.load %arg1[%c0, %c0_0] : memref<8x128xf32, #tpu.memory_space<vmem>>, vector<8x128xf32>
    %c0_1 = arith.constant 0 : index
    %c0_2 = arith.constant 0 : index
    %1 = vector.load %arg2[%c0_1, %c0_2] : memref<24x8xf32, #tpu.memory_space<vmem>>, vector<24x8xf32>
    %c0_3 = arith.constant 0 : index
    %c0_4 = arith.constant 0 : index
    %2 = vector.load %arg3[%c0_3, %c0_4] : memref<24x1xf32, #tpu.memory_space<vmem>>, vector<24x1xf32>
    %cst = arith.constant dense<0.000000e+00> : vector<24x128xf32>
    %3 = tpu.matmul %1, %0, %cst {dimension_numbers = #tpu.dot_dimension_numbers<[1], [0], [0], [1], [0, 0, 1, 1], [], []>} : vector<24x8xf32>, vector<8x128xf32>, vector<24x128xf32> -> vector<24x128xf32>
    %4 = vector.broadcast %2 : vector<24x1xf32> to vector<24x128xf32>
    %5 = arith.addf %3, %4 : vector<24x128xf32>
    %6 = math.tanh %5 : vector<24x128xf32>
    %c0_5 = arith.constant 0 : index
    %c0_6 = arith.constant 0 : index
    %7 = vector.load %arg4[%c0_5, %c0_6] : memref<24x24xf32, #tpu.memory_space<vmem>>, vector<24x24xf32>
    %c0_7 = arith.constant 0 : index
    %c0_8 = arith.constant 0 : index
    %8 = vector.load %arg5[%c0_7, %c0_8] : memref<24x1xf32, #tpu.memory_space<vmem>>, vector<24x1xf32>
    %cst_9 = arith.constant dense<0.000000e+00> : vector<24x128xf32>
    %9 = tpu.matmul %7, %6, %cst_9 {dimension_numbers = #tpu.dot_dimension_numbers<[1], [0], [0], [1], [0, 0, 1, 1], [], []>} : vector<24x24xf32>, vector<24x128xf32>, vector<24x128xf32> -> vector<24x128xf32>
    %10 = vector.broadcast %8 : vector<24x1xf32> to vector<24x128xf32>
    %11 = arith.addf %9, %10 : vector<24x128xf32>
    %12 = math.tanh %11 : vector<24x128xf32>
    %c0_10 = arith.constant 0 : index
    %c0_11 = arith.constant 0 : index
    %13 = vector.load %arg6[%c0_10, %c0_11] : memref<40x24xf32, #tpu.memory_space<vmem>>, vector<40x24xf32>
    %c0_12 = arith.constant 0 : index
    %c0_13 = arith.constant 0 : index
    %14 = vector.load %arg7[%c0_12, %c0_13] : memref<40x1xf32, #tpu.memory_space<vmem>>, vector<40x1xf32>
    %cst_14 = arith.constant dense<0.000000e+00> : vector<40x128xf32>
    %15 = tpu.matmul %13, %12, %cst_14 {dimension_numbers = #tpu.dot_dimension_numbers<[1], [0], [0], [1], [0, 0, 1, 1], [], []>} : vector<40x24xf32>, vector<24x128xf32>, vector<40x128xf32> -> vector<40x128xf32>
    %16 = vector.broadcast %14 : vector<40x1xf32> to vector<40x128xf32>
    %17 = arith.addf %15, %16 : vector<40x128xf32>
    %18 = math.tanh %17 : vector<40x128xf32>
    %c0_15 = arith.constant 0 : index
    %c0_16 = arith.constant 0 : index
    %19 = vector.load %arg8[%c0_15, %c0_16] : memref<40x40xf32, #tpu.memory_space<vmem>>, vector<40x40xf32>
    %c0_17 = arith.constant 0 : index
    %c0_18 = arith.constant 0 : index
    %20 = vector.load %arg9[%c0_17, %c0_18] : memref<40x1xf32, #tpu.memory_space<vmem>>, vector<40x1xf32>
    %cst_19 = arith.constant dense<0.000000e+00> : vector<40x128xf32>
    %21 = tpu.matmul %19, %18, %cst_19 {dimension_numbers = #tpu.dot_dimension_numbers<[1], [0], [0], [1], [0, 0, 1, 1], [], []>} : vector<40x40xf32>, vector<40x128xf32>, vector<40x128xf32> -> vector<40x128xf32>
    %22 = vector.broadcast %20 : vector<40x1xf32> to vector<40x128xf32>
    %23 = arith.addf %21, %22 : vector<40x128xf32>
    %24 = math.tanh %23 : vector<40x128xf32>
    %c0_20 = arith.constant 0 : index
    %c0_21 = arith.constant 0 : index
    %25 = vector.load %arg10[%c0_20, %c0_21] : memref<24x40xf32, #tpu.memory_space<vmem>>, vector<24x40xf32>
    %c0_22 = arith.constant 0 : index
    %c0_23 = arith.constant 0 : index
    %26 = vector.load %arg11[%c0_22, %c0_23] : memref<24x1xf32, #tpu.memory_space<vmem>>, vector<24x1xf32>
    %cst_24 = arith.constant dense<0.000000e+00> : vector<24x128xf32>
    %27 = tpu.matmul %25, %24, %cst_24 {dimension_numbers = #tpu.dot_dimension_numbers<[1], [0], [0], [1], [0, 0, 1, 1], [], []>} : vector<24x40xf32>, vector<40x128xf32>, vector<24x128xf32> -> vector<24x128xf32>
    %28 = vector.broadcast %26 : vector<24x1xf32> to vector<24x128xf32>
    %29 = arith.addf %27, %28 : vector<24x128xf32>
    %30 = math.tanh %29 : vector<24x128xf32>
    %c0_25 = arith.constant 0 : index
    %c0_26 = arith.constant 0 : index
    %31 = vector.load %arg12[%c0_25, %c0_26] : memref<24x24xf32, #tpu.memory_space<vmem>>, vector<24x24xf32>
    %c0_27 = arith.constant 0 : index
    %c0_28 = arith.constant 0 : index
    %32 = vector.load %arg13[%c0_27, %c0_28] : memref<24x1xf32, #tpu.memory_space<vmem>>, vector<24x1xf32>
    %cst_29 = arith.constant dense<0.000000e+00> : vector<24x128xf32>
    %33 = tpu.matmul %31, %30, %cst_29 {dimension_numbers = #tpu.dot_dimension_numbers<[1], [0], [0], [1], [0, 0, 1, 1], [], []>} : vector<24x24xf32>, vector<24x128xf32>, vector<24x128xf32> -> vector<24x128xf32>
    %34 = vector.broadcast %32 : vector<24x1xf32> to vector<24x128xf32>
    %35 = arith.addf %33, %34 : vector<24x128xf32>
    %36 = math.tanh %35 : vector<24x128xf32>
    %c0_30 = arith.constant 0 : index
    %c0_31 = arith.constant 0 : index
    %37 = vector.load %arg14[%c0_30, %c0_31] : memref<8x24xf32, #tpu.memory_space<vmem>>, vector<8x24xf32>
    %c0_32 = arith.constant 0 : index
    %c0_33 = arith.constant 0 : index
    %38 = vector.load %arg15[%c0_32, %c0_33] : memref<8x1xf32, #tpu.memory_space<vmem>>, vector<8x1xf32>
    %cst_34 = arith.constant dense<0.000000e+00> : vector<8x128xf32>
    %39 = tpu.matmul %37, %36, %cst_34 {dimension_numbers = #tpu.dot_dimension_numbers<[1], [0], [0], [1], [0, 0, 1, 1], [], []>} : vector<8x24xf32>, vector<24x128xf32>, vector<8x128xf32> -> vector<8x128xf32>
    %40 = vector.broadcast %38 : vector<8x1xf32> to vector<8x128xf32>
    %41 = arith.addf %39, %40 : vector<8x128xf32>
    %c0_35 = arith.constant 0 : index
    %c0_36 = arith.constant 0 : index
    %42 = vector.load %arg16[%c0_35, %c0_36] : memref<8x128xf32, #tpu.memory_space<vmem>>, vector<8x128xf32>
    tpu.vector_store %arg16[%c0_35, %c0_36], %41 {strides = array<i32>} : memref<8x128xf32, #tpu.memory_space<vmem>>, vector<8x128xf32>,
    return
  }
  func.func @transform_0(%arg0: i32) -> (i32, i32) {
    %c0_i32 = arith.constant 0 : i32
    %c0_i32_0 = arith.constant 0 : i32
    return %c0_i32, %arg0 : i32, i32
  }
  func.func @transform_1(%arg0: i32) -> (i32, i32) {
    %c0_i32 = arith.constant 0 : i32
    %c0_i32_0 = arith.constant 0 : i32
    %c0_i32_1 = arith.constant 0 : i32
    return %c0_i32, %c0_i32_0 : i32, i32
  }
  func.func @transform_2(%arg0: i32) -> (i32, i32) {
    %c0_i32 = arith.constant 0 : i32
    %c0_i32_0 = arith.constant 0 : i32
    %c0_i32_1 = arith.constant 0 : i32
    return %c0_i32, %c0_i32_0 : i32, i32
  }
  func.func @transform_3(%arg0: i32) -> (i32, i32) {
    %c0_i32 = arith.constant 0 : i32
    %c0_i32_0 = arith.constant 0 : i32
    %c0_i32_1 = arith.constant 0 : i32
    return %c0_i32, %c0_i32_0 : i32, i32
  }
  func.func @transform_4(%arg0: i32) -> (i32, i32) {
    %c0_i32 = arith.constant 0 : i32
    %c0_i32_0 = arith.constant 0 : i32
    %c0_i32_1 = arith.constant 0 : i32
    return %c0_i32, %c0_i32_0 : i32, i32
  }
  func.func @transform_5(%arg0: i32) -> (i32, i32) {
    %c0_i32 = arith.constant 0 : i32
    %c0_i32_0 = arith.constant 0 : i32
    %c0_i32_1 = arith.constant 0 : i32
    return %c0_i32, %c0_i32_0 : i32, i32
  }
  func.func @transform_6(%arg0: i32) -> (i32, i32) {
    %c0_i32 = arith.constant 0 : i32
    %c0_i32_0 = arith.constant 0 : i32
    %c0_i32_1 = arith.constant 0 : i32
    return %c0_i32, %c0_i32_0 : i32, i32
  }
  func.func @transform_7(%arg0: i32) -> (i32, i32) {
    %c0_i32 = arith.constant 0 : i32
    %c0_i32_0 = arith.constant 0 : i32
    %c0_i32_1 = arith.constant 0 : i32
    return %c0_i32, %c0_i32_0 : i32, i32
  }
  func.func @transform_8(%arg0: i32) -> (i32, i32) {
    %c0_i32 = arith.constant 0 : i32
    %c0_i32_0 = arith.constant 0 : i32
    %c0_i32_1 = arith.constant 0 : i32
    return %c0_i32, %c0_i32_0 : i32, i32
  }
  func.func @transform_9(%arg0: i32) -> (i32, i32) {
    %c0_i32 = arith.constant 0 : i32
    %c0_i32_0 = arith.constant 0 : i32
    %c0_i32_1 = arith.constant 0 : i32
    return %c0_i32, %c0_i32_0 : i32, i32
  }
  func.func @transform_10(%arg0: i32) -> (i32, i32) {
    %c0_i32 = arith.constant 0 : i32
    %c0_i32_0 = arith.constant 0 : i32
    %c0_i32_1 = arith.constant 0 : i32
    return %c0_i32, %c0_i32_0 : i32, i32
  }
  func.func @transform_11(%arg0: i32) -> (i32, i32) {
    %c0_i32 = arith.constant 0 : i32
    %c0_i32_0 = arith.constant 0 : i32
    %c0_i32_1 = arith.constant 0 : i32
    return %c0_i32, %c0_i32_0 : i32, i32
  }
  func.func @transform_12(%arg0: i32) -> (i32, i32) {
    %c0_i32 = arith.constant 0 : i32
    %c0_i32_0 = arith.constant 0 : i32
    %c0_i32_1 = arith.constant 0 : i32
    return %c0_i32, %c0_i32_0 : i32, i32
  }
  func.func @transform_13(%arg0: i32) -> (i32, i32) {
    %c0_i32 = arith.constant 0 : i32
    %c0_i32_0 = arith.constant 0 : i32
    %c0_i32_1 = arith.constant 0 : i32
    return %c0_i32, %c0_i32_0 : i32, i32
  }
  func.func @transform_14(%arg0: i32) -> (i32, i32) {
    %c0_i32 = arith.constant 0 : i32
    %c0_i32_0 = arith.constant 0 : i32
    %c0_i32_1 = arith.constant 0 : i32
    return %c0_i32, %c0_i32_0 : i32, i32
  }
  func.func @transform_15(%arg0: i32) -> (i32, i32) {
    %c0_i32 = arith.constant 0 : i32
    %c0_i32_0 = arith.constant 0 : i32
    return %c0_i32, %arg0 : i32, i32
  }
}

</mosaic_0001>

<bundles_post_ra>
// kernel: pinn_forward.1
= control target key start
LH: loop header
LB: loop body
LE: loop exit
PB: predicated region body
PF: predicated region fallthrough
CT: control target
= control target key end

     0   :  { %vm72_vm0 = vcmask 64512   ;;  %v1114_v0 = vmov 0.0   ;;  %vm1115_vm1 = vmmov 0   ;;  %v1116_v3 = vmov 0   ;;  %s1433_s0 = inlined_call_operand.vmem [shape: f32[8,128], index: 0, kind: input, shape index: {}]   ;;  %s1434_s1 = inlined_call_operand.vmem [shape: f32[24,8], index: 1, kind: input, shape index: {}]   ;;  %s1435_s2 = inlined_call_operand.vmem [shape: f32[24,1], index: 2, kind: input, shape index: {}]   ;;  %s1436_s4 = inlined_call_operand.vmem [shape: f32[24,1], index: 4, kind: input, shape index: {}]   ;;  %s1437_s6 = inlined_call_operand.vmem [shape: f32[40,1], index: 6, kind: input, shape index: {}]   ;;  %s1438_s8 = inlined_call_operand.vmem [shape: f32[40,1], index: 8, kind: input, shape index: {}]   ;;  %s1439_s10 = inlined_call_operand.vmem [shape: f32[24,1], index: 10, kind: input, shape index: {}]   ;;  %s1440_s12 = inlined_call_operand.vmem [shape: f32[24,1], index: 12, kind: input, shape index: {}]   ;;  %s1441_s14 = inlined_call_operand.vmem [shape: f32[8,1], index: 14, kind: input, shape index: {}]   ;;  %s1442_s3 = inlined_call_operand.vmem [shape: f32[24,24], index: 3, kind: input, shape index: {}]   ;;  %s1443_s5 = inlined_call_operand.vmem [shape: f32[40,24], index: 5, kind: input, shape index: {}]   ;;  %s1444_s7 = inlined_call_operand.vmem [shape: f32[40,40], index: 7, kind: input, shape index: {}]   ;;  %s1445_s9 = inlined_call_operand.vmem [shape: f32[24,40], index: 9, kind: input, shape index: {}]   ;;  %s1446_s11 = inlined_call_operand.vmem [shape: f32[24,24], index: 11, kind: input, shape index: {}]   ;;  %s1447_s13 = inlined_call_operand.vmem [shape: f32[8,24], index: 13, kind: input, shape index: {}]   ;;  %s1448_s15 = inlined_call_operand.vmem [shape: f32[8,128], index: 15, kind: output, shape index: {}]  }
   0x1   :  { %950 = vmatprep.subr.mxu0 %v1114_v0  ;;  %v50_v1 = vld [vmem:[%s1433_s0] sm:$0xff]  ;;  %952 = vmatprep.mubr.msk.f32.mxu0 %vm1115_vm1, %v1114_v0  ;;  %v56_v4 = vld [vmem:[%s1435_s2 + $0x10] sm:$0xff]  ;;  %v52_v6 = vld [vmem:[%s1434_s1 + $0x8] sm:$0xff]  ;;  %vm186_vm2 = vcmask 195584   ;;  %vm459_vm3 = vcmask 326656  }
   0x2   :  { %v51_v2 = vld [vmem:[%s1434_s1] sm:$0xff]  ;;  %951 = vmatpush3.msra.mxu0 %v50_v1  ;;  %1068 = vset.pattern.permute.xlu0 %v1116_v3  ;;  %v55_v7 = vld [vmem:[%s1435_s2 + $0x8] sm:$0xff]  ;;  %v170_v8 = vld [vmem:[%s1436_s4 + $0x10] sm:$0xff] }
   0x3   :  { %953 = vmatmul.mubr.msk.f32.vlgmr.msra.gmra.mxu0 %vm72_vm0, %v51_v2  ;;  %69 = vperm.xlu0 %1068, %v56_v4   ;;  %v54_v5 = vld [vmem:[%s1435_s2] sm:$0xff]  ;;  %v53_v9 = vld [vmem:[%s1434_s1 + $0x10] sm:$0xff]  ;;  %v169_v10 = vld [vmem:[%s1436_s4 + $0x8] sm:$0xff] }
   0x4   :  { %955 = vmatprep.mubr.msk.f32.mxu0 %vm1115_vm1, %v1114_v0  ;;  %1069 = vset.pattern.permute.xlu1 %v1116_v3  ;;  %v168_v11 = vld [vmem:[%s1436_s4] sm:$0xff]  ;;  %v287_v13 = vld [vmem:[%s1437_s6 + $0x18] sm:$0xff]  ;;  %v286_v14 = vld [vmem:[%s1437_s6 + $0x10] sm:$0xff] }
   0x5   :  { %59 = vperm.xlu1 %1069, %v54_v5   ;;  %961 = vmatprep.subr.mxu1 %v1114_v0  ;;  %v288_v12 = vld [vmem:[%s1437_s6 + $0x20] sm:$0xff]  ;;  %v285_v15 = vld [vmem:[%s1437_s6 + $0x8] sm:$0xff]  ;;  %v432_v18 = vld [vmem:[%s1438_s8 + $0x18] sm:$0xff] }
   0x6   :  { %967 = vmatprep.mubr.msk.f32.mxu1 %vm1115_vm1, %v1114_v0  ;;  %976 = vmatprep.subr.mxu0 %v1114_v0  ;;  %v284_v16 = vld [vmem:[%s1437_s6] sm:$0xff]  ;;  %v431_v19 = vld [vmem:[%s1438_s8 + $0x10] sm:$0xff]  ;;  %v430_v20 = vld [vmem:[%s1438_s8 + $0x8] sm:$0xff] }
   0x7   :  { %956 = vmatmul.mubr.msk.f32.gmra.mxu0 %vm72_vm0, %v52_v6  ;;  %64 = vperm.xlu0 %1068, %v55_v7   ;;  %v433_v17 = vld [vmem:[%s1438_s8 + $0x20] sm:$0xff]  ;;  %v575_v22 = vld [vmem:[%s1439_s10 + $0x10] sm:$0xff]  ;;  %v574_v23 = vld [vmem:[%s1439_s10 + $0x8] sm:$0xff] }
   0x8   :  { %958 = vmatprep.mubr.msk.f32.mxu0 %vm1115_vm1, %v1114_v0  ;;  %v429_v21 = vld [vmem:[%s1438_s8] sm:$0xff]  ;;  %v688_v25 = vld [vmem:[%s1440_s12 + $0x10] sm:$0xff]  ;;  %v687_v26 = vld [vmem:[%s1440_s12 + $0x8] sm:$0xff] }
   0x9   :  { %183 = vperm.xlu1 %1069, %v170_v8   ;;  %v573_v24 = vld [vmem:[%s1439_s10] sm:$0xff]  ;;  %v166_v45 = vld [vmem:[%s1442_s3 + $0x8] sm:$0xff]  ;;  %v167_v46 = vld [vmem:[%s1442_s3 + $0x10] sm:$0xff] }
   0xa   :  { %v686_v27 = vld [vmem:[%s1440_s12] sm:$0xff]  ;;  %v280_v63 = vld [vmem:[%s1443_s5 + $0x8] sm:$0xff]  ;;  %v281_v1 = vld [vmem:[%s1443_s5 + $0x10] sm:$0xff] }
   0xb   :  { %959 = vmatmul.mubr.msk.f32.gmra.mxu0 %vm72_vm0, %v53_v9  ;;  %178 = vperm.xlu0 %1068, %v169_v10   ;;  %v797_v28 = vld [vmem:[%s1441_s14] sm:$0xff]  ;;  %v282_v2 = vld [vmem:[%s1443_s5 + $0x18] sm:$0xff] }
   0xc   :  { %982 = vmatprep.mubr.msk.f32.mxu0 %vm1115_vm1, %v1114_v0  ;;  %v165_v43 = vld [vmem:[%s1442_s3] sm:$0xff] }
   0xd   :  { %173 = vperm.xlu1 %1069, %v168_v11   ;;  %v279_v61 = vld [vmem:[%s1443_s5] sm:$0xff] }
   0xe   :  { %v283_v3 = vld [vmem:[%s1443_s5 + $0x20] sm:$0xff] }
   0xf   :  { %311 = vperm.xlu0 %1068, %v288_v12  }
  0x11   :  { %306 = vperm.xlu1 %1069, %v287_v13  }
  0x13   :  { %301 = vperm.xlu0 %1068, %v286_v14  }
  0x15   :  { %296 = vperm.xlu1 %1069, %v285_v15  }
  0x17   :  { %291 = vperm.xlu0 %1068, %v284_v16  }
  0x19   :  { %456 = vperm.xlu1 %1069, %v433_v17  }
  0x1b   :  { %451 = vperm.xlu0 %1068, %v432_v18  }
  0x1d   :  { %446 = vperm.xlu1 %1069, %v431_v19  }
  0x1f   :  { %441 = vperm.xlu0 %1068, %v430_v20  }
  0x21   :  { %436 = vperm.xlu1 %1069, %v429_v21  }
  0x23   :  { %588 = vperm.xlu0 %1068, %v575_v22  }
  0x25   :  { %583 = vperm.xlu1 %1069, %v574_v23  }
  0x27   :  { %578 = vperm.xlu0 %1068, %v573_v24  }
  0x29   :  { %701 = vperm.xlu1 %1069, %v688_v25  }
  0x2b   :  { %696 = vperm.xlu0 %1068, %v687_v26  }
  0x2d   :  { %691 = vperm.xlu1 %1069, %v686_v27  }
  0x2f   :  { %800 = vperm.xlu0 %1068, %v797_v28   ;;  %v424_v28 = vld [vmem:[%s1444_s7] sm:$0xff] }
  0x7e   :  { %v70_v30 = vpop.permute.xlu0 %69 }
  0x80   :  { %v60_v38 = vpop.permute.xlu1 %59 }
  0x82   :  { %v65_v34 = vpop.permute.xlu0 %64 }
  0x84   :  { %v184_v49 = vpop.permute.xlu1 %183 }
  0x86   :  { %v179_v52 = vpop.permute.xlu0 %178 }
  0x88   :  { %v174_v56 = vpop.permute.xlu1 %173 }
  0x8a   :  { %v312_v9 = vpop.permute.xlu0 %311 }
  0x8c   :  { %v307_v12 = vpop.permute.xlu1 %306 }
  0x8e   :  { %v302_v14 = vpop.permute.xlu0 %301 }
  0x90   :  { %v297_v20 = vpop.permute.xlu1 %296 }
  0x92   :  { %v292_v22 = vpop.permute.xlu0 %291 }
  0xc3   :  { %v148_v29 = vpop.f32.mrf.mxu0 }
  0xc4   :  { %v149_v40 = vadd.f32 %v148_v29, %v60_v38 }
  0xc5   :  { %v954_v31 = vpop.f32.mrf.mxu0 }
  0xc6   :  { %v426_v31 = vld [vmem:[%s1444_s7 + $0x10] sm:$0xff] }
  0xc7   :  { %v153_v32 = vpop.f32.mrf.mxu0 }
  0xc8   :  { %v154_v36 = vadd.f32 %v153_v32, %v65_v34  ;;  %v427_v32 = vld [vmem:[%s1444_s7 + $0x18] sm:$0xff] }
  0xc9   :  { %v957_v33 = vpop.f32.mrf.mxu0 }
  0xca   :  { %v428_v33 = vld [vmem:[%s1444_s7 + $0x20] sm:$0xff] }
  0xcb   :  { %v158_v35 = vpop.f32.mrf.mxu0 }
  0xcc   :  { %v159_v37 = vadd.f32 %v158_v35, %v70_v30  ;;  %v425_v30 = vld [vmem:[%s1444_s7 + $0x8] sm:$0xff] }
  0xcd   :  { %v960_v39 = vpop.f32.mrf.mxu0 }
  0xce   :  { %1070 = vtanh.f32 %v159_v37  ;;  %v457_v39 = vpop.permute.xlu1 %456 }
  0xcf   :  { %1072 = vtanh.f32 %v154_v36 }
  0xd0   :  { %1074 = vtanh.f32 %v149_v40 }
  0xdb   :  { %v1071_v41 = vpop.eup %1070 }
  0xdc   :  { %962 = vmatpush3.msra.mxu1 %v1071_v41  ;;  %v1073_v42 = vpop.eup %1072 }
  0xdd   :  { %963 = vmatprep.subr.mxu1 %v1114_v0  ;;  %v1075_v44 = vpop.eup %1074 }
  0xde   :  { %964 = vmatpush3.msra.mxu1 %v1073_v42  ;;  %v452_v42 = vpop.permute.xlu0 %451 }
  0xdf   :  { %965 = vmatprep.subr.mxu1 %v1114_v0 }
  0xe0   :  { %966 = vmatpush3.msra.mxu1 %v1075_v44  ;;  %v447_v44 = vpop.permute.xlu1 %446 }
  0xe1   :  { %968 = vmatmul.mubr.msk.f32.vlgmr.msra.gmra.mxu1 %vm186_vm2, %v165_v43  ;;  %997 = vmatprep.subr.mxu1 %v1114_v0 }
  0xe2   :  { %970 = vmatprep.mubr.msk.f32.mxu1 %vm1115_vm1, %v1114_v0 }
  0xe5   :  { %971 = vmatmul.mubr.msk.f32.gmra.mxu1 %vm186_vm2, %v166_v45 }
  0xe6   :  { %973 = vmatprep.mubr.msk.f32.mxu1 %vm1115_vm1, %v1114_v0 }
  0xe9   :  { %974 = vmatmul.mubr.msk.f32.gmra.mxu1 %vm186_vm2, %v167_v46 }
  0xea   :  { %1007 = vmatprep.mubr.msk.f32.mxu1 %vm1115_vm1, %v1114_v0 }
 0x1a1   :  { %v262_v47 = vpop.f32.mrf.mxu1 }
 0x1a2   :  { %v263_v58 = vadd.f32 %v262_v47, %v174_v56 }
 0x1a3   :  { %v969_v48 = vpop.f32.mrf.mxu1 }
 0x1a5   :  { %v267_v50 = vpop.f32.mrf.mxu1 }
 0x1a6   :  { %v268_v54 = vadd.f32 %v267_v50, %v179_v52  ;;  %v442_v50 = vpop.permute.xlu0 %441  ;;  %v437_v52 = vpop.permute.xlu1 %436 }
 0x1a7   :  { %v972_v51 = vpop.f32.mrf.mxu1 }
 0x1a9   :  { %v272_v53 = vpop.f32.mrf.mxu1 }
 0x1aa   :  { %v273_v55 = vadd.f32 %v272_v53, %v184_v49 }
 0x1ab   :  { %v975_v57 = vpop.f32.mrf.mxu1 }
 0x1ac   :  { %1076 = vtanh.f32 %v273_v55 }
 0x1ad   :  { %1078 = vtanh.f32 %v268_v54 }
 0x1ae   :  { %1080 = vtanh.f32 %v263_v58  ;;  %v570_v58 = vld [vmem:[%s1445_s9] sm:$0xff] }
 0x1b9   :  { %v1077_v59 = vpop.eup %1076 }
 0x1ba   :  { %977 = vmatpush3.msra.mxu0 %v1077_v59  ;;  %v1079_v60 = vpop.eup %1078 }
 0x1bb   :  { %978 = vmatprep.subr.mxu0 %v1114_v0  ;;  %v1081_v62 = vpop.eup %1080 }
 0x1bc   :  { %979 = vmatpush3.msra.mxu0 %v1079_v60  ;;  %v571_v60 = vld [vmem:[%s1445_s9 + $0x8] sm:$0xff] }
 0x1bd   :  { %980 = vmatprep.subr.mxu0 %v1114_v0 }
 0x1be   :  { %981 = vmatpush3.msra.mxu0 %v1081_v62 }
 0x1bf   :  { %983 = vmatmul.mubr.msk.f32.vlgmr.msra.gmra.mxu0 %vm186_vm2, %v279_v61  ;;  %1022 = vmatprep.subr.mxu0 %v1114_v0  ;;  %v572_v61 = vld [vmem:[%s1445_s9 + $0x10] sm:$0xff] }
 0x1c0   :  { %985 = vmatprep.mubr.msk.f32.mxu0 %vm1115_vm1, %v1114_v0 }
 0x1c3   :  { %986 = vmatmul.mubr.msk.f32.gmra.mxu0 %vm186_vm2, %v280_v63 }
 0x1c4   :  { %988 = vmatprep.mubr.msk.f32.mxu0 %vm1115_vm1, %v1114_v0 }
 0x1c7   :  { %989 = vmatmul.mubr.msk.f32.gmra.mxu0 %vm186_vm2, %v281_v1  ;;  %v589_v1 = vpop.permute.xlu0 %588 }
 0x1c8   :  { %991 = vmatprep.mubr.msk.f32.mxu0 %vm1115_vm1, %v1114_v0 }
 0x1cb   :  { %992 = vmatmul.mubr.msk.f32.gmra.mxu0 %vm186_vm2, %v282_v2 }
 0x1cc   :  { %994 = vmatprep.mubr.msk.f32.mxu0 %vm1115_vm1, %v1114_v0 }
 0x1cf   :  { %995 = vmatmul.mubr.msk.f32.gmra.mxu0 %vm186_vm2, %v283_v3 }
 0x1d0   :  { %1032 = vmatprep.mubr.msk.f32.mxu0 %vm1115_vm1, %v1114_v0 }
 0x27f   :  { %v395_v4 = vpop.f32.mrf.mxu0 }
 0x280   :  { %v396_v23 = vadd.f32 %v395_v4, %v292_v22  ;;  %v584_v4 = vpop.permute.xlu1 %583 }
 0x281   :  { %v984_v5 = vpop.f32.mrf.mxu0 }
 0x283   :  { %v400_v6 = vpop.f32.mrf.mxu0 }
 0x284   :  { %v401_v21 = vadd.f32 %v400_v6, %v297_v20 }
 0x285   :  { %v987_v7 = vpop.f32.mrf.mxu0 }
 0x287   :  { %v405_v8 = vpop.f32.mrf.mxu0 }
 0x288   :  { %v406_v19 = vadd.f32 %v405_v8, %v302_v14  ;;  %v579_v8 = vpop.permute.xlu0 %578 }
 0x289   :  { %v990_v10 = vpop.f32.mrf.mxu0 }
 0x28b   :  { %v410_v11 = vpop.f32.mrf.mxu0 }
 0x28c   :  { %v411_v16 = vadd.f32 %v410_v11, %v307_v12  ;;  %v697_v22 = vpop.permute.xlu0 %696 }
 0x28d   :  { %v993_v13 = vpop.f32.mrf.mxu0 }
 0x28e   :  { %v683_v13 = vld [vmem:[%s1446_s11] sm:$0xff] }
 0x28f   :  { %v415_v15 = vpop.f32.mrf.mxu0 }
 0x290   :  { %v416_v17 = vadd.f32 %v415_v15, %v312_v9  ;;  %v684_v15 = vld [vmem:[%s1446_s11 + $0x8] sm:$0xff] }
 0x291   :  { %v996_v18 = vpop.f32.mrf.mxu0 }
 0x292   :  { %1082 = vtanh.f32 %v416_v17 }
 0x293   :  { %1084 = vtanh.f32 %v411_v16  ;;  %v685_v16 = vld [vmem:[%s1446_s11 + $0x10] sm:$0xff] }
 0x294   :  { %1086 = vtanh.f32 %v406_v19  ;;  %v702_v19 = vpop.permute.xlu1 %701 }
 0x295   :  { %1088 = vtanh.f32 %v401_v21 }
 0x296   :  { %1090 = vtanh.f32 %v396_v23 }
 0x29f   :  { %v1083_v24 = vpop.eup %1082 }
 0x2a0   :  { %998 = vmatpush3.msra.mxu1 %v1083_v24  ;;  %v1085_v25 = vpop.eup %1084 }
 0x2a1   :  { %999 = vmatprep.subr.mxu1 %v1114_v0  ;;  %v1087_v26 = vpop.eup %1086 }
 0x2a2   :  { %1000 = vmatpush3.msra.mxu1 %v1085_v25  ;;  %v1089_v27 = vpop.eup %1088 }
 0x2a3   :  { %1001 = vmatprep.subr.mxu1 %v1114_v0  ;;  %v1091_v29 = vpop.eup %1090 }
 0x2a4   :  { %1002 = vmatpush3.msra.mxu1 %v1087_v26  ;;  %v692_v26 = vpop.permute.xlu1 %691 }
 0x2a5   :  { %1003 = vmatprep.subr.mxu1 %v1114_v0 }
 0x2a6   :  { %1004 = vmatpush3.msra.mxu1 %v1089_v27 }
 0x2a7   :  { %1005 = vmatprep.subr.mxu1 %v1114_v0 }
 0x2a8   :  { %1006 = vmatpush3.msra.mxu1 %v1091_v29 }
 0x2a9   :  { %1008 = vmatmul.mubr.msk.f32.vlgmr.msra.gmra.mxu1 %vm459_vm3, %v424_v28  ;;  %1041 = vmatprep.subr.mxu1 %v1114_v0 }
 0x2aa   :  { %1010 = vmatprep.mubr.msk.f32.mxu1 %vm1115_vm1, %v1114_v0 }
 0x2ad   :  { %1011 = vmatmul.mubr.msk.f32.gmra.mxu1 %vm459_vm3, %v425_v30 }
 0x2ae   :  { %1013 = vmatprep.mubr.msk.f32.mxu1 %vm1115_vm1, %v1114_v0 }
 0x2b1   :  { %1014 = vmatmul.mubr.msk.f32.gmra.mxu1 %vm459_vm3, %v426_v31  ;;  %v796_v31 = vld [vmem:[%s1447_s13] sm:$0xff] }
 0x2b2   :  { %1016 = vmatprep.mubr.msk.f32.mxu1 %vm1115_vm1, %v1114_v0 }
 0x2b5   :  { %1017 = vmatmul.mubr.msk.f32.gmra.mxu1 %vm459_vm3, %v427_v32 }
 0x2b6   :  { %1019 = vmatprep.mubr.msk.f32.mxu1 %vm1115_vm1, %v1114_v0 }
 0x2b9   :  { %1020 = vmatmul.mubr.msk.f32.gmra.mxu1 %vm459_vm3, %v428_v33  ;;  %v801_v33 = vpop.permute.xlu0 %800 }
 0x2ba   :  { %1047 = vmatprep.mubr.msk.f32.mxu1 %vm1115_vm1, %v1114_v0 }
 0x369   :  { %v541_v34 = vpop.f32.mrf.mxu1 }
 0x36a   :  { %v542_v53 = vadd.f32 %v541_v34, %v437_v52 }
 0x36b   :  { %v1009_v35 = vpop.f32.mrf.mxu1 }
 0x36d   :  { %v546_v36 = vpop.f32.mrf.mxu1 }
 0x36e   :  { %v547_v51 = vadd.f32 %v546_v36, %v442_v50 }
 0x36f   :  { %v1012_v37 = vpop.f32.mrf.mxu1 }
 0x371   :  { %v551_v38 = vpop.f32.mrf.mxu1 }
 0x372   :  { %v552_v49 = vadd.f32 %v551_v38, %v447_v44 }
 0x373   :  { %v1015_v40 = vpop.f32.mrf.mxu1 }
 0x375   :  { %v556_v41 = vpop.f32.mrf.mxu1 }
 0x376   :  { %v557_v46 = vadd.f32 %v556_v41, %v452_v42 }
 0x377   :  { %v1018_v43 = vpop.f32.mrf.mxu1 }
 0x379   :  { %v561_v45 = vpop.f32.mrf.mxu1 }
 0x37a   :  { %v562_v47 = vadd.f32 %v561_v45, %v457_v39 }
 0x37b   :  { %v1021_v48 = vpop.f32.mrf.mxu1 }
 0x37c   :  { %1092 = vtanh.f32 %v562_v47 }
 0x37d   :  { %1094 = vtanh.f32 %v557_v46 }
 0x37e   :  { %1096 = vtanh.f32 %v552_v49 }
 0x37f   :  { %1098 = vtanh.f32 %v547_v51 }
 0x380   :  { %1100 = vtanh.f32 %v542_v53 }
 0x389   :  { %v1093_v54 = vpop.eup %1092 }
 0x38a   :  { %1023 = vmatpush3.msra.mxu0 %v1093_v54  ;;  %v1095_v55 = vpop.eup %1094 }
 0x38b   :  { %1024 = vmatprep.subr.mxu0 %v1114_v0  ;;  %v1097_v56 = vpop.eup %1096 }
 0x38c   :  { %1025 = vmatpush3.msra.mxu0 %v1095_v55  ;;  %v1099_v57 = vpop.eup %1098 }
 0x38d   :  { %1026 = vmatprep.subr.mxu0 %v1114_v0  ;;  %v1101_v59 = vpop.eup %1100 }
 0x38e   :  { %1027 = vmatpush3.msra.mxu0 %v1097_v56 }
 0x38f   :  { %1028 = vmatprep.subr.mxu0 %v1114_v0 }
 0x390   :  { %1029 = vmatpush3.msra.mxu0 %v1099_v57 }
 0x391   :  { %1030 = vmatprep.subr.mxu0 %v1114_v0 }
 0x392   :  { %1031 = vmatpush3.msra.mxu0 %v1101_v59 }
 0x393   :  { %1033 = vmatmul.mubr.msk.f32.vlgmr.msra.gmra.mxu0 %vm459_vm3, %v570_v58  ;;  %1056 = vmatprep.subr.mxu0 %v1114_v0 }
 0x394   :  { %1035 = vmatprep.mubr.msk.f32.mxu0 %vm1115_vm1, %v1114_v0 }
 0x397   :  { %1036 = vmatmul.mubr.msk.f32.gmra.mxu0 %vm459_vm3, %v571_v60 }
 0x398   :  { %1038 = vmatprep.mubr.msk.f32.mxu0 %vm1115_vm1, %v1114_v0 }
 0x39b   :  { %1039 = vmatmul.mubr.msk.f32.gmra.mxu0 %vm459_vm3, %v572_v61 }
 0x39c   :  { %1062 = vmatprep.mubr.msk.f32.mxu0 %vm1115_vm1, %v1114_v0 }
 0x453   :  { %v666_v62 = vpop.f32.mrf.mxu0 }
 0x454   :  { %v667_v10 = vadd.f32 %v666_v62, %v579_v8 }
 0x455   :  { %v1034_v63 = vpop.f32.mrf.mxu0 }
 0x457   :  { %v671_v2 = vpop.f32.mrf.mxu0 }
 0x458   :  { %v672_v6 = vadd.f32 %v671_v2, %v584_v4 }
 0x459   :  { %v1037_v3 = vpop.f32.mrf.mxu0 }
 0x45b   :  { %v676_v5 = vpop.f32.mrf.mxu0 }
 0x45c   :  { %v677_v7 = vadd.f32 %v676_v5, %v589_v1 }
 0x45d   :  { %v1040_v9 = vpop.f32.mrf.mxu0 }
 0x45e   :  { %1102 = vtanh.f32 %v677_v7 }
 0x45f   :  { %1104 = vtanh.f32 %v672_v6 }
 0x460   :  { %1106 = vtanh.f32 %v667_v10 }
 0x46b   :  { %v1103_v11 = vpop.eup %1102 }
 0x46c   :  { %1042 = vmatpush3.msra.mxu1 %v1103_v11  ;;  %v1105_v12 = vpop.eup %1104 }
 0x46d   :  { %1043 = vmatprep.subr.mxu1 %v1114_v0  ;;  %v1107_v14 = vpop.eup %1106 }
 0x46e   :  { %1044 = vmatpush3.msra.mxu1 %v1105_v12 }
 0x46f   :  { %1045 = vmatprep.subr.mxu1 %v1114_v0 }
 0x470   :  { %1046 = vmatpush3.msra.mxu1 %v1107_v14 }
 0x471   :  { %1048 = vmatmul.mubr.msk.f32.vlgmr.msra.gmra.mxu1 %vm186_vm2, %v683_v13 }
 0x472   :  { %1050 = vmatprep.mubr.msk.f32.mxu1 %vm1115_vm1, %v1114_v0 }
 0x475   :  { %1051 = vmatmul.mubr.msk.f32.gmra.mxu1 %vm186_vm2, %v684_v15 }
 0x476   :  { %1053 = vmatprep.mubr.msk.f32.mxu1 %vm1115_vm1, %v1114_v0 }
 0x479   :  { %1054 = vmatmul.mubr.msk.f32.gmra.mxu1 %vm186_vm2, %v685_v16 }
 0x531   :  { %v779_v17 = vpop.f32.mrf.mxu1 }
 0x532   :  { %v780_v28 = vadd.f32 %v779_v17, %v692_v26 }
 0x533   :  { %v1049_v18 = vpop.f32.mrf.mxu1 }
 0x535   :  { %v784_v20 = vpop.f32.mrf.mxu1 }
 0x536   :  { %v785_v24 = vadd.f32 %v784_v20, %v697_v22 }
 0x537   :  { %v1052_v21 = vpop.f32.mrf.mxu1 }
 0x539   :  { %v789_v23 = vpop.f32.mrf.mxu1 }
 0x53a   :  { %v790_v25 = vadd.f32 %v789_v23, %v702_v19 }
 0x53b   :  { %v1055_v27 = vpop.f32.mrf.mxu1 }
 0x53c   :  { %1108 = vtanh.f32 %v790_v25 }
 0x53d   :  { %1110 = vtanh.f32 %v785_v24 }
 0x53e   :  { %1112 = vtanh.f32 %v780_v28 }
 0x549   :  { %v1109_v29 = vpop.eup %1108 }
 0x54a   :  { %1057 = vmatpush3.msra.mxu0 %v1109_v29  ;;  %v1111_v30 = vpop.eup %1110 }
 0x54b   :  { %1058 = vmatprep.subr.mxu0 %v1114_v0  ;;  %v1113_v32 = vpop.eup %1112 }
 0x54c   :  { %1059 = vmatpush3.msra.mxu0 %v1111_v30 }
 0x54d   :  { %1060 = vmatprep.subr.mxu0 %v1114_v0 }
 0x54e   :  { %1061 = vmatpush3.msra.mxu0 %v1113_v32 }
 0x54f   :  { %1063 = vmatmul.mubr.msk.f32.vlgmr.msra.gmra.mxu0 %vm186_vm2, %v796_v31 }
 0x60f   :  { %v872_v34 = vpop.f32.mrf.mxu0 }
 0x610   :  { %v873_v35 = vadd.f32 %v872_v34, %v801_v33 }
 0x611   :  { %v1064_v36 = vpop.f32.mrf.mxu0 }
 0x612   :  { %876 = vst [vmem:[%s1448_s15] sm:$0xff] %v873_v35 }

</bundles_post_ra>
